<compile_context>
chip_gen: v5e
topology: v5e:2x2
jax: 0.10.0
libtpu: 0.0.40
codegen_flags: <defaults>
</compile_context>

<pallas_src>
import math
from functools import partial
from typing import NamedTuple

import jax
import jax.numpy as jnp
from jax.experimental import pallas as pl
from jax.experimental.pallas import tpu as pltpu


def _round_up(x, m):
    return ((x + m - 1) // m) * m


class Meta(NamedTuple):
    """Static layout of the packed parameter buffer (hashable -> jit-static)."""
    input_dim: int
    H: int
    dk: int
    S: int
    Na: int
    Nl: int
    Din_p: int      # per-branch input slot width (padded to a multiple of 8)
    C4: int         # 4 * H   (merged hidden width, lane-dense: 128 at H=32)
    Cqkv: int       # 2 * dk + H  (merged q|k|v output width)
    off_w1: int
    off_b1: int
    off_w2: int
    off_b2: int
    off_wqkv: int
    off_bqkv: int
    rows: int
    width: int


# ---------------------------------------------------------------------------
# One-time parameter packing (outside the hot path).  Every weight/bias lands
# in a single tile-padded (rows x width) f32 buffer -> ONE HBM->VMEM DMA/call.
# ---------------------------------------------------------------------------
def pack_params(params, n_agent, n_landmark):
    H = params['action_w2'].shape[1]
    dk = params['wq'].shape[1]
    input_dim = params['agent_w1'].shape[0]
    S = 2 + n_agent + n_landmark
    Din_p = _round_up(max(5, input_dim), 8)
    C4 = 4 * H
    Cqkv = 2 * dk + H
    width = _round_up(max(C4, Cqkv), 128)
    S_p = _round_up(S, 8)

    # branch id -> (name, fan_in, first row, last row) within the S positions
    branches = [
        ('action', 5, 0, 1),
        ('agent', input_dim, 1, 1 + n_agent),
        ('landmark', input_dim, 1 + n_agent, 1 + n_agent + n_landmark),
        ('wall', input_dim, S - 1, S),
    ]

    w1_blk = jnp.zeros((4 * Din_p, C4), jnp.float32)
    w2_blk = jnp.zeros((C4, C4), jnp.float32)
    # Per-row biases: zeros outside each row's branch slot, so ReLU keeps the
    # other slots exactly zero (required for the stacked [wq|wk|wv] to be
    # mathematically identical to the original per-branch projections).
    b1_rows = jnp.zeros((S, C4), jnp.float32)
    b2_rows = jnp.zeros((S, C4), jnp.float32)
    for bi, (name, fin, r0, r1) in enumerate(branches):
        w1_blk = w1_blk.at[bi * Din_p:bi * Din_p + fin,
                           bi * H:(bi + 1) * H].set(params[f'{name}_w1'])
        w2_blk = w2_blk.at[bi * H:(bi + 1) * H,
                           bi * H:(bi + 1) * H].set(params[f'{name}_w2'])
        b1_rows = b1_rows.at[r0:r1, bi * H:(bi + 1) * H].set(
            jnp.broadcast_to(params[f'{name}_b1'], (r1 - r0, H)))
        b2_rows = b2_rows.at[r0:r1, bi * H:(bi + 1) * H].set(
            jnp.broadcast_to(params[f'{name}_b2'], (r1 - r0, H)))

    # Stacked attention projections ([wq|wk|wv] repeated for each branch slot).
    wqkv = jnp.tile(
        jnp.concatenate([params['wq'], params['wk'], params['wv']], axis=1),
        (4, 1))                                                     # (4H, 2dk+H)
    bqkv = jnp.concatenate([params['bq'], params['bk'], params['bv']], axis=1)

    # Section offsets, each 8-row aligned so in-kernel slices hit tile bounds.
    off_w1 = 0
    off_b1 = off_w1 + 4 * Din_p
    off_w2 = off_b1 + S_p
    off_b2 = off_w2 + C4
    off_wqkv = off_b2 + S_p
    off_bqkv = off_wqkv + C4
    rows = off_bqkv + 8

    packed = jnp.zeros((rows, width), jnp.float32)
    packed = packed.at[off_w1:off_w1 + 4 * Din_p, :C4].set(w1_blk)
    packed = packed.at[off_b1:off_b1 + S, :C4].set(b1_rows)
    packed = packed.at[off_w2:off_w2 + C4, :C4].set(w2_blk)
    packed = packed.at[off_b2:off_b2 + S, :C4].set(b2_rows)
    packed = packed.at[off_wqkv:off_wqkv + C4, :Cqkv].set(wqkv)
    packed = packed.at[off_bqkv:off_bqkv + 1, :Cqkv].set(bqkv)

    meta = Meta(input_dim=input_dim, H=H, dk=dk, S=S, Na=n_agent, Nl=n_landmark,
                Din_p=Din_p, C4=C4, Cqkv=Cqkv,
                off_w1=off_w1, off_b1=off_b1, off_w2=off_w2, off_b2=off_b2,
                off_wqkv=off_wqkv, off_bqkv=off_bqkv, rows=rows, width=width)
    return packed, meta


# ---------------------------------------------------------------------------
# Fused kernel: block-diagonal 2-layer MLP -> stacked Q|K|V -> row-0 attention.
# Two inputs (packed data, packed params), one merged output.  No grid.
# ---------------------------------------------------------------------------
def _inversenet_fused_kernel(x_ref, p_ref, out_ref, *, meta, batch, w_rows):
    H, dk, S = meta.H, meta.dk, meta.S
    C4, Cqkv, Din4 = meta.C4, meta.Cqkv, 4 * meta.Din_p
    B, R = batch, w_rows
    f32 = jnp.float32

    x = x_ref[...]                                                  # (B*S, 4*Din_p)

    # Static slices into the single packed parameter buffer.
    w1 = p_ref[meta.off_w1:meta.off_w1 + Din4, 0:C4]                # (4Din_p, 4H)
    b1 = p_ref[meta.off_b1:meta.off_b1 + S, 0:C4]                   # (S, 4H)
    w2 = p_ref[meta.off_w2:meta.off_w2 + C4, 0:C4]                  # (4H, 4H)
    b2 = p_ref[meta.off_b2:meta.off_b2 + S, 0:C4]                   # (S, 4H)
    wqkv = p_ref[meta.off_wqkv:meta.off_wqkv + C4, 0:Cqkv]          # (4H, 2dk+H)
    bqkv = p_ref[meta.off_bqkv:meta.off_bqkv + 1, 0:Cqkv]           # (1, 2dk+H)

    # Per-position biases tiled over the (small, static) batch.
    b1_t = jnp.concatenate([b1] * B, axis=0) if B > 1 else b1       # (B*S, 4H)
    b2_t = jnp.concatenate([b2] * B, axis=0) if B > 1 else b2

    # Block-diagonal 2-layer MLP over all B*S rows: two lane-dense matmuls.
    # Rows stay exactly zero outside their branch's H-wide slot (bias is only
    # applied inside the slot, ReLU(0)=0), so the stacked projections below are
    # exact.
    h = jnp.maximum(jnp.dot(x, w1, preferred_element_type=f32) + b1_t, 0.0)
    h = jnp.maximum(jnp.dot(h, w2, preferred_element_type=f32) + b2_t, 0.0)

    # Q | K | V in a single matmul against the stacked projection weights.
    qkv = jnp.dot(h, wqkv, preferred_element_type=f32) + bqkv       # (B*S, 2dk+H)
    q3 = qkv[:, 0:dk].reshape(B, S, dk)
    k3 = qkv[:, dk:2 * dk].reshape(B, S, dk)
    v3 = qkv[:, 2 * dk:2 * dk + H].reshape(B, S, H)

    # Attention for query position 0 only (the module only returns row 0).
    # Scores on the VPU: broadcast-multiply + lane reduce (no tiny MXU matvec).
    q0 = q3[:, 0:1, :] * (1.0 / math.sqrt(dk))                      # (B, 1, dk)
    scores = jnp.sum(q0 * k3, axis=-1)                              # (B, S)
    m = jnp.max(scores, axis=-1, keepdims=True)
    e = jnp.exp(scores - m)
    w = e / jnp.sum(e, axis=-1, keepdims=True)                      # exact softmax
    w_row = w[:, None, :]                                           # (B, 1, S)
    wg = jnp.einsum('bqs,bsh->bqh', w_row, v3,
                    preferred_element_type=f32)                     # (B, 1, H)

    # Merged output: rows [0, S) = V, row S = weighted_gf0, rows >= S+1 = w0.
    out_ref[:, 0:S, :] = v3
    out_ref[:, S:S + 1, :] = wg
    out_ref[:, S + 1:S + 1 + R, :] = jnp.zeros((B, R, H), f32)
    for ri in range(R):                                             # usually R == 1
        lo = ri * H
        span = min(H, S - lo)
        out_ref[:, S + 1 + ri:S + 2 + ri, 0:span] = w_row[:, :, lo:lo + span]


# ---------------------------------------------------------------------------
# Wrapper: pack data inputs, call the kernel once, split the merged output.
# ---------------------------------------------------------------------------
@partial(jax.jit, static_argnames=("meta",))
def inversenet_landmark_forward(packed, meta, action, agent_gf, landmark_gf, wall_gf):
    """Returns (weight[:,0,:], weighted_gf[:,0,:], value) like the PyTorch module."""
    B = action.shape[0]
    S, H, Din_p, Din = meta.S, meta.H, meta.Din_p, meta.input_dim
    Na, Nl = meta.Na, meta.Nl
    f32 = jnp.float32

    # Pack the 4 data inputs into one (B*S, 4*Din_p) buffer; each row carries
    # its branch's raw features in that branch's column slot (zeros elsewhere)
    # so the block-diagonal weights route it through the right MLP. -> 1 DMA.
    x = jnp.zeros((B, S, 4 * Din_p), f32)
    x = x.at[:, 0, 0:5].set(action.astype(f32))
    x = x.at[:, 1:1 + Na, Din_p:Din_p + Din].set(agent_gf.astype(f32))
    x = x.at[:, 1 + Na:1 + Na + Nl,
             2 * Din_p:2 * Din_p + Din].set(landmark_gf.astype(f32))
    x = x.at[:, S - 1, 3 * Din_p:3 * Din_p + Din].set(wall_gf.astype(f32))
    x = x.reshape(B * S, 4 * Din_p)

    R = -(-S // H)   # rows needed to hold the S attention weights (usually 1)

    vmem = pl.BlockSpec(memory_space=pltpu.MemorySpace.VMEM)
    # Single no-grid invocation: only B*S (=16) rows of work; per-grid-step
    # overhead (~0.35us) would dominate.
    # TODO(synk): once B*S per core exceeds ~128 rows (bigger rollout batches),
    # add a batch grid axis with dimension_semantics=("parallel",) for v7x's two
    # TensorCores, widen the packed hidden lanes toward 256 for v6e/v7x's MXU,
    # and cast matmul operands to bf16 on v5e (keep f32 accumulation).
    out = pl.pallas_call(
        partial(_inversenet_fused_kernel, meta=meta, batch=B, w_rows=R),
        out_shape=jax.ShapeDtypeStruct((B, S + 1 + R, H), f32),
        in_specs=[vmem, vmem],
        out_specs=vmem,
    )(x, packed)

    value = out[:, :S, :]
    weighted_gf0 = out[:, S, :]
    weight0 = out[:, S + 1:, :].reshape(B, R * H)[:, :S]
    return weight0, weighted_gf0, value


# ---------------------------------------------------------------------------
# Deterministic parameter init (PyTorch Linear-style uniform bounds).
# ---------------------------------------------------------------------------
def init_params(key, input_dim, hidden_dim, dk):
    names_dims = [
        ('action', 5, hidden_dim), ('agent', input_dim, hidden_dim),
        ('landmark', input_dim, hidden_dim), ('wall', input_dim, hidden_dim),
    ]
    params = {}
    keys = iter(jax.random.split(key, 4 * 4 + 6))

    def lin(fin, fout):
        bound = 1.0 / math.sqrt(fin)
        w = jax.random.uniform(next(keys), (fin, fout), jnp.float32, -bound, bound)
        b = jax.random.uniform(next(keys), (1, fout), jnp.float32, -bound, bound)
        return w, b

    for name, fin, h in names_dims:
        params[f'{name}_w1'], params[f'{name}_b1'] = lin(fin, h)
        params[f'{name}_w2'], params[f'{name}_b2'] = lin(h, h)

    params['wq'], params['bq'] = lin(hidden_dim, dk)
    params['wk'], params['bk'] = lin(hidden_dim, dk)
    params['wv'], params['bv'] = lin(hidden_dim, hidden_dim)
    return params


# ---------------------------------------------------------------------------
# Pure-JAX reference (mirrors the PyTorch forward) for a correctness check.
# ---------------------------------------------------------------------------
def reference_forward(params, action, agent_gf, landmark_gf, wall_gf, dk):
    def mlp(x, p):
        h = jnp.maximum(x @ params[f'{p}_w1'] + params[f'{p}_b1'], 0.0)
        return jnp.maximum(h @ params[f'{p}_w2'] + params[f'{p}_b2'], 0.0)

    act = mlp(action, 'action')
    ag = mlp(agent_gf, 'agent')
    lm = mlp(landmark_gf, 'landmark')
    wl = mlp(wall_gf, 'wall')
    obs = jnp.concatenate([act[:, None, :], ag, lm, wl[:, None, :]], axis=1)
    q = obs @ params['wq'] + params['bq']
    k = obs @ params['wk'] + params['bk']
    v = obs @ params['wv'] + params['bv']
    scores = jnp.einsum('bqd,bkd->bqk', q, k) / math.sqrt(dk)
    w = jax.nn.softmax(scores, axis=2)
    wg = jnp.einsum('bqk,bkh->bqh', w, v)
    return w[:, 0, :], wg[:, 0, :], v


if __name__ == "__main__":
    B = 2
    input_dim = 6
    hidden_dim = 32
    dk = 16
    n_agent = 3
    n_landmark = 3
    S = 2 + n_agent + n_landmark

    key = jax.random.PRNGKey(0)
    kp, ka, kag, klm, kwl = jax.random.split(key, 5)

    params = init_params(kp, input_dim, hidden_dim, dk)
    # Packed once, outside the hot path (would be reused across rollout steps).
    packed, meta = pack_params(params, n_agent, n_landmark)

    action = jax.random.normal(ka, (B, 5), jnp.float32)
    agent_gf = jax.random.normal(kag, (B, n_agent, input_dim), jnp.float32)
    landmark_gf = jax.random.normal(klm, (B, n_landmark, input_dim), jnp.float32)
    wall_gf = jax.random.normal(kwl, (B, input_dim), jnp.float32)

    weight0, weighted_gf0, value = jax.block_until_ready(
        inversenet_landmark_forward(packed, meta, action, agent_gf,
                                    landmark_gf, wall_gf))

    # Reference at full f32 matmul precision; kernel uses exact softmax division
    # and f32 MXU matmuls, so tolerances are tight (only f32 reassociation).
    with jax.default_matmul_precision("float32"):
        ref_w0, ref_wg0, ref_v = reference_forward(
            params, action, agent_gf, landmark_gf, wall_gf, dk)

    assert weight0.shape == (B, S)
    assert weighted_gf0.shape == (B, hidden_dim)
    assert value.shape == (B, S, hidden_dim)
    assert jnp.allclose(value, ref_v, rtol=1e-4, atol=1e-4)
    assert jnp.allclose(weight0, ref_w0, rtol=1e-4, atol=1e-4)
    assert jnp.allclose(weighted_gf0, ref_wg0, rtol=1e-4, atol=1e-4)

    print("KERNEL_OK")
</pallas_src>

<mosaic_0001>
module attributes {stable_mosaic.version = 11 : i64} {
  func.func @_inversenet_fused_kernel(%arg0: memref<16x32xf32, #tpu.memory_space<vmem>>, %arg1: memref<312x128xf32, #tpu.memory_space<vmem>>, %arg2: memref<2x10x32xf32, #tpu.memory_space<vmem>>) attributes {dimension_semantics = [], scalar_prefetch = 0 : i64, scratch_operands = 0 : i64, tpu.core_type = #tpu.core_type<tc>} {
    %c0 = arith.constant 0 : index
    %c0_0 = arith.constant 0 : index
    %0 = vector.load %arg0[%c0, %c0_0] : memref<16x32xf32, #tpu.memory_space<vmem>>, vector<16x32xf32>
    %c0_1 = arith.constant 0 : index
    %c0_2 = arith.constant 0 : index
    %1 = vector.load %arg1[%c0_1, %c0_2] : memref<312x128xf32, #tpu.memory_space<vmem>>, vector<32x128xf32>
    %c32 = arith.constant 32 : index
    %c0_3 = arith.constant 0 : index
    %2 = vector.load %arg1[%c32, %c0_3] : memref<312x128xf32, #tpu.memory_space<vmem>>, vector<8x128xf32>
    %c40 = arith.constant 40 : index
    %c0_4 = arith.constant 0 : index
    %3 = vector.load %arg1[%c40, %c0_4] : memref<312x128xf32, #tpu.memory_space<vmem>>, vector<128x128xf32>
    %c168 = arith.constant 168 : index
    %c0_5 = arith.constant 0 : index
    %4 = vector.load %arg1[%c168, %c0_5] : memref<312x128xf32, #tpu.memory_space<vmem>>, vector<8x128xf32>
    %c176 = arith.constant 176 : index
    %c0_6 = arith.constant 0 : index
    %5 = vector.load %arg1[%c176, %c0_6] : memref<312x128xf32, #tpu.memory_space<vmem>>, vector<128x64xf32>
    %c304 = arith.constant 304 : index
    %c0_7 = arith.constant 0 : index
    %6 = vector.load %arg1[%c304, %c0_7] : memref<312x128xf32, #tpu.memory_space<vmem>>, vector<1x64xf32>
    %7 = tpu.concatenate %2, %2 in 0 : vector<8x128xf32>, vector<8x128xf32> -> vector<16x128xf32>
    %8 = tpu.concatenate %4, %4 in 0 : vector<8x128xf32>, vector<8x128xf32> -> vector<16x128xf32>
    %cst = arith.constant dense<0.000000e+00> : vector<16x128xf32>
    %9 = tpu.matmul %0, %1, %cst {dimension_numbers = #tpu.dot_dimension_numbers<[1], [0], [0], [1], [0, 0, 1, 1], [], []>} : vector<16x32xf32>, vector<32x128xf32>, vector<16x128xf32> -> vector<16x128xf32>
    %10 = arith.addf %9, %7 : vector<16x128xf32>
    %cst_8 = arith.constant 0.000000e+00 : f32
    %11 = vector.broadcast %cst_8 : f32 to vector<16x128xf32>
    %12 = arith.maximumf %10, %11 : vector<16x128xf32>
    %cst_9 = arith.constant dense<0.000000e+00> : vector<16x128xf32>
    %13 = tpu.matmul %12, %3, %cst_9 {dimension_numbers = #tpu.dot_dimension_numbers<[1], [0], [0], [1], [0, 0, 1, 1], [], []>} : vector<16x128xf32>, vector<128x128xf32>, vector<16x128xf32> -> vector<16x128xf32>
    %14 = arith.addf %13, %8 : vector<16x128xf32>
    %cst_10 = arith.constant 0.000000e+00 : f32
    %15 = vector.broadcast %cst_10 : f32 to vector<16x128xf32>
    %16 = arith.maximumf %14, %15 : vector<16x128xf32>
    %cst_11 = arith.constant dense<0.000000e+00> : vector<16x64xf32>
    %17 = tpu.matmul %16, %5, %cst_11 {dimension_numbers = #tpu.dot_dimension_numbers<[1], [0], [0], [1], [0, 0, 1, 1], [], []>} : vector<16x128xf32>, vector<128x64xf32>, vector<16x64xf32> -> vector<16x64xf32>
    %18 = vector.broadcast %6 : vector<1x64xf32> to vector<16x64xf32>
    %19 = arith.addf %17, %18 : vector<16x64xf32>
    %20 = vector.extract_strided_slice %19 {offsets = [0, 0], sizes = [16, 16], strides = [1, 1]} : vector<16x64xf32> to vector<16x16xf32>
    %21 = vector.shape_cast %20 : vector<16x16xf32> to vector<2x8x16xf32>
    %22 = vector.extract_strided_slice %19 {offsets = [0, 16], sizes = [16, 16], strides = [1, 1]} : vector<16x64xf32> to vector<16x16xf32>
    %23 = vector.shape_cast %22 : vector<16x16xf32> to vector<2x8x16xf32>
    %24 = vector.extract_strided_slice %19 {offsets = [0, 32], sizes = [16, 32], strides = [1, 1]} : vector<16x64xf32> to vector<16x32xf32>
    %25 = vector.shape_cast %24 : vector<16x32xf32> to vector<2x8x32xf32>
    %26 = vector.extract_strided_slice %21 {offsets = [0, 0, 0], sizes = [2, 1, 16], strides = [1, 1, 1]} : vector<2x8x16xf32> to vector<2x1x16xf32>
    %cst_12 = arith.constant 2.500000e-01 : f32
    %27 = vector.broadcast %cst_12 : f32 to vector<2x1x16xf32>
    %28 = arith.mulf %26, %27 : vector<2x1x16xf32>
    %29 = vector.broadcast %28 : vector<2x1x16xf32> to vector<2x8x16xf32>
    %30 = arith.mulf %29, %23 : vector<2x8x16xf32>
    %cst_13 = arith.constant dense<0.000000e+00> : vector<2x8xf32>
    %31 = vector.multi_reduction <add>, %30, %cst_13 [2] : vector<2x8x16xf32> to vector<2x8xf32>
    %cst_14 = arith.constant dense<0xFF800000> : vector<2xf32>
    %32 = vector.multi_reduction <maximumf>, %31, %cst_14 [1] : vector<2x8xf32> to vector<2xf32>
    %33 = vector.shape_cast %32 : vector<2xf32> to vector<2x1xf32>
    %34 = vector.broadcast %33 : vector<2x1xf32> to vector<2x8xf32>
    %35 = arith.subf %31, %34 : vector<2x8xf32>
    %36 = math.exp %35 : vector<2x8xf32>
    %cst_15 = arith.constant dense<0.000000e+00> : vector<2xf32>
    %37 = vector.multi_reduction <add>, %36, %cst_15 [1] : vector<2x8xf32> to vector<2xf32>
    %38 = vector.shape_cast %37 : vector<2xf32> to vector<2x1xf32>
    %39 = vector.broadcast %38 : vector<2x1xf32> to vector<2x8xf32>
    %40 = arith.divf %36, %39 : vector<2x8xf32>
    %41 = vector.shape_cast %40 : vector<2x8xf32> to vector<2x1x8xf32>
    "tpu.trace_start"() <{level = 10 : i32, message = "bqs,bsh->bqh"}> : () -> ()
    %cst_16 = arith.constant dense<0.000000e+00> : vector<2x1x32xf32>
    %42 = tpu.matmul %41, %25, %cst_16 {dimension_numbers = #tpu.dot_dimension_numbers<[2], [1], [1], [2], [0, 0, 0, 1, 1, 2], [0], [0]>} : vector<2x1x8xf32>, vector<2x8x32xf32>, vector<2x1x32xf32> -> vector<2x1x32xf32>
    "tpu.trace_stop"() : () -> ()
    %c0_17 = arith.constant 0 : index
    %c0_18 = arith.constant 0 : index
    %c0_19 = arith.constant 0 : index
    %43 = vector.load %arg2[%c0_17, %c0_18, %c0_19] : memref<2x10x32xf32, #tpu.memory_space<vmem>>, vector<2x8x32xf32>
    tpu.vector_store %arg2[%c0_17, %c0_18, %c0_19], %25 {strides = array<i32>} : memref<2x10x32xf32, #tpu.memory_space<vmem>>, vector<2x8x32xf32>,
    %c0_20 = arith.constant 0 : index
    %c8 = arith.constant 8 : index
    %c0_21 = arith.constant 0 : index
    %44 = vector.load %arg2[%c0_20, %c8, %c0_21] : memref<2x10x32xf32, #tpu.memory_space<vmem>>, vector<2x1x32xf32>
    tpu.vector_store %arg2[%c0_20, %c8, %c0_21], %42 {strides = array<i32>} : memref<2x10x32xf32, #tpu.memory_space<vmem>>, vector<2x1x32xf32>,
    %cst_22 = arith.constant 0.000000e+00 : f32
    %45 = vector.broadcast %cst_22 : f32 to vector<2x1x32xf32>
    %c0_23 = arith.constant 0 : index
    %c9 = arith.constant 9 : index
    %c0_24 = arith.constant 0 : index
    %46 = vector.load %arg2[%c0_23, %c9, %c0_24] : memref<2x10x32xf32, #tpu.memory_space<vmem>>, vector<2x1x32xf32>
    tpu.vector_store %arg2[%c0_23, %c9, %c0_24], %45 {strides = array<i32>} : memref<2x10x32xf32, #tpu.memory_space<vmem>>, vector<2x1x32xf32>,
    %c0_25 = arith.constant 0 : index
    %c9_26 = arith.constant 9 : index
    %c0_27 = arith.constant 0 : index
    %47 = vector.load %arg2[%c0_25, %c9_26, %c0_27] : memref<2x10x32xf32, #tpu.memory_space<vmem>>, vector<2x1x8xf32>
    tpu.vector_store %arg2[%c0_25, %c9_26, %c0_27], %41 {strides = array<i32>} : memref<2x10x32xf32, #tpu.memory_space<vmem>>, vector<2x1x8xf32>,
    return
  }
}

</mosaic_0001>

<bundles_post_ra>
// kernel: inversenet_landmark_forward.1
= control target key start
LH: loop header
LB: loop body
LE: loop exit
PB: predicated region body
PF: predicated region fallthrough
CT: control target
= control target key end

     0   :  { %7 = vsyncpa [#allocation3], 0  ;;  %s371_s12 = smov [#allocation2]   ;;  %s372_s14 = smov 128   ;;  %s446_s0 = inlined_call_operand.vmem [shape: f32[16,32], index: 0, kind: input, shape index: {}]   ;;  %s447_s1 = inlined_call_operand.hbm [shape: f32[312,128], index: 1, kind: input, shape index: {}]   ;;  %s448_s2 = inlined_call_operand.vmem [shape: f32[2,10,32], index: 2, kind: output, shape index: {}]  }
   0x1   :  { %s14_s11 = sshll.u32 %s447_s1, 4  ;;  %s16_s13 = sshll.u32 %s371_s12, 4  ;;  %s15_s11 = int_to_ptr.hbm [resolvable:$true] %s14_s11  ;;  %s17_s13 = int_to_ptr.vmem [resolvable:$true] %s16_s13 }
   0x2   :  { %s373_s15 = smov 8  }
   0x3   :  { %22 = dma.hbm_to_vmem [thread:$0]  %s15_s11, 4992, %s17_s13, [#allocation3], %s372_s14, %s372_s14, %s373_s15  }
   0x4   :  { %369 = dma.done.wait [#allocation3], 4992  }
   0x5   :  { %370 = vsyncadd [#allocation3], 4294962304  ;;  %v32_v0 = vld [vmem:[#allocation2 + $0x18] sm:$0xff]  ;;  %v31_v1 = vld [vmem:[#allocation2 + $0x10] sm:$0xff]  ;;  %vm68_vm0 = vcmask 261120   ;;  %vm163_vm1 = vcmask 130048  }
   0x6   :  { %87 = vmatpush.msra.mxu0 %v32_v0  ;;  %v30_v2 = vld [vmem:[#allocation2 + $0x8] sm:$0xff]  ;;  %v49_v3 = vld [vmem:[#allocation2 + $0xa0] sm:$0xff]  ;;  %v48_v4 = vld [vmem:[#allocation2 + $0x98] sm:$0xff]  ;;  %vm176_vm2 = vcmask 1041409   ;;  %vm179_vm3 = vcmask 58368   ;;  %s376_s19 = smov 96  }
   0x7   :  { %100 = vmatpush.msra.mxu1 %v49_v3  ;;  %v29_v5 = vld [vmem:[#allocation2] sm:$0xff]  ;;  %v47_v6 = vld [vmem:[#allocation2 + $0x90] sm:$0xff]  ;;  %v46_v8 = vld [vmem:[#allocation2 + $0x88] sm:$0xff]  ;;  %vm307_vm12 = vcmask 253952   ;;  %vm314_vm13 = vcmask 57344   ;;  %vm252_vm14 = vcmask 64512  }
   0x8   :  { %88 = vmatpush.msra.mxu0 %v31_v1  ;;  %v27_v7 = vld [vmem:[%s446_s0] sm:$0xff]  ;;  %v44_v10 = vld [vmem:[#allocation2 + $0x78] sm:$0xff]  ;;  %v43_v11 = vld [vmem:[#allocation2 + $0x70] sm:$0xff] }
   0x9   :  { %101 = vmatpush.msra.mxu1 %v48_v4  ;;  %v45_v9 = vld [vmem:[#allocation2 + $0x80] sm:$0xff]  ;;  %v28_v12 = vld [vmem:[%s446_s0 + $0x8] sm:$0xff]  ;;  %v40_v15 = vld [vmem:[#allocation2 + $0x58] sm:$0xff]  ;;  %s374_s0 = smov 112   ;;  %v172_v4 = vlaneseq }
   0xa   :  { %89 = vmatpush.msra.mxu0 %v30_v2  ;;  %v42_v13 = vld [vmem:[#allocation2 + $0x68] sm:$0xff]  ;;  %v41_v14 = vld [vmem:[#allocation2 + $0x60] sm:$0xff]  ;;  %v39_v16 = vld [vmem:[#allocation2 + $0x50] sm:$0xff] }
   0xb   :  { %102 = vmatpush.msra.mxu1 %v47_v6  ;;  %v38_v17 = vld [vmem:[#allocation2 + $0x48] sm:$0xff]  ;;  %v37_v18 = vld [vmem:[#allocation2 + $0x40] sm:$0xff]  ;;  %v36_v19 = vld [vmem:[#allocation2 + $0x38] sm:$0xff] }
   0xc   :  { %90 = vmatpush.msra.mxu0 %v29_v5  ;;  %v35_v20 = vld [vmem:[#allocation2 + $0x30] sm:$0xff]  ;;  %v34_v21 = vld [vmem:[#allocation2 + $0x28] sm:$0xff]  ;;  %v65_v23 = vld [vmem:[#allocation2 + $0x120] sm:$0xff]  ;;  %v404_v5 = vand.u32 127, %v172_v4 }
   0xd   :  { %322 = vmatmul.msk.f32.vlgmr.msra.gmra.mxu0 %vm68_vm0, %v27_v7  ;;  %103 = vmatpush.msra.mxu1 %v46_v8  ;;  %v66_v22 = vld [vmem:[#allocation2 + $0x128] sm:$0xff]  ;;  %v64_v24 = vld [vmem:[#allocation2 + $0x118] sm:$0xff]  ;;  %v63_v25 = vld [vmem:[#allocation2 + $0x110] sm:$0xff] }
   0xe   :  { %126 = vmatpush.msra.mxu2 %v66_v22  ;;  %v62_v26 = vld [vmem:[#allocation2 + $0x108] sm:$0xff]  ;;  %v61_v27 = vld [vmem:[#allocation2 + $0x100] sm:$0xff]  ;;  %v60_v28 = vld [vmem:[#allocation2 + $0xf8] sm:$0xff] }
   0xf   :  { %104 = vmatpush.msra.mxu1 %v45_v9  ;;  %v59_v29 = vld [vmem:[#allocation2 + $0xf0] sm:$0xff]  ;;  %v58_v30 = vld [vmem:[#allocation2 + $0xe8] sm:$0xff]  ;;  %v57_v31 = vld [vmem:[#allocation2 + $0xe0] sm:$0xff] }
  0x10   :  { %127 = vmatpush.msra.mxu2 %v65_v23  ;;  %v33_v32 = vld [vmem:[#allocation2 + $0x20] sm:$0xff]  ;;  %v56_v33 = vld [vmem:[#allocation2 + $0xd8] sm:$0xff]  ;;  %v55_v36 = vld [vmem:[#allocation2 + $0xd0] sm:$0xff] }
  0x11   :  { %105 = vmatpush.msra.mxu1 %v44_v10  ;;  %v54_v38 = vld [vmem:[#allocation2 + $0xc8] sm:$0xff]  ;;  %v53_v42 = vld [vmem:[#allocation2 + $0xc0] sm:$0xff]  ;;  %v52_v43 = vld [vmem:[#allocation2 + $0xb8] sm:$0xff] }
  0x12   :  { %128 = vmatpush.msra.mxu2 %v64_v24  ;;  %v51_v44 = vld [vmem:[#allocation2 + $0xb0] sm:$0xff]  ;;  %v50_v45 = vld [vmem:[#allocation2 + $0xa8] sm:$0xff] }
  0x13   :  { %106 = vmatpush.msra.mxu1 %v43_v11  ;;  %v336_v52 = vld [vmem:[#allocation2 + $0x130] ss:$0 sm:$0xff]  ;;  %v375_v11 = vmov 0  }
  0x14   :  { %129 = vmatpush.msra.mxu2 %v63_v25  ;;  %334 = vset.pattern.permute.xlu0 %v375_v11 }
  0x15   :  { %323 = vmatmul.msk.f32.gmra.mxu0 %vm68_vm0, %v28_v12  ;;  %107 = vmatpush.msra.mxu1 %v42_v13 }
  0x16   :  { %130 = vmatpush.msra.mxu2 %v62_v26  ;;  %333 = vset.pattern.permute.xlu2 %v375_v11 }
  0x17   :  { %108 = vmatpush.msra.mxu1 %v41_v14  ;;  %335 = vset.pattern.permute.xlu1 %v375_v11 }
  0x18   :  { %131 = vmatpush.msra.mxu2 %v61_v27 }
  0x19   :  { %109 = vmatpush.msra.mxu1 %v40_v15 }
  0x1a   :  { %132 = vmatpush.msra.mxu2 %v60_v28 }
  0x1b   :  { %110 = vmatpush.msra.mxu1 %v39_v16 }
  0x1c   :  { %133 = vmatpush.msra.mxu2 %v59_v29 }
  0x1d   :  { %111 = vmatpush.msra.mxu1 %v38_v17 }
  0x1e   :  { %134 = vmatpush.msra.mxu2 %v58_v30 }
  0x1f   :  { %112 = vmatpush.msra.mxu1 %v37_v18 }
  0x20   :  { %135 = vmatpush.msra.mxu2 %v57_v31 }
  0x21   :  { %113 = vmatpush.msra.mxu1 %v36_v19 }
  0x22   :  { %136 = vmatpush.msra.mxu2 %v56_v33 }
  0x23   :  { %114 = vmatpush.msra.mxu1 %v35_v20 }
  0x24   :  { %137 = vmatpush.msra.mxu2 %v55_v36 }
  0x25   :  { %115 = vmatpush.msra.mxu1 %v34_v21 }
  0x26   :  { %138 = vmatpush.msra.mxu2 %v54_v38 }
  0x28   :  { %139 = vmatpush.msra.mxu2 %v53_v42 }
  0x2a   :  { %140 = vmatpush.msra.mxu2 %v52_v43 }
  0x2c   :  { %141 = vmatpush.msra.mxu2 %v51_v44 }
  0x8a   :  { %v92_v34 = vpop.f32.mrf.mxu0 }
  0x8b   :  { %v93_v35 = vadd.f32 %v92_v34, %v33_v32 }
  0x8d   :  { %v98_v37 = vmax.f32 %v93_v35, 0.0 }
  0x8f   :  { %116 = vmatmul.f32.vlgmr.msra.gmra.mxu1 %v98_v37 }
  0x92   :  { %v95_v39 = vpop.f32.mrf.mxu0 }
  0x93   :  { %v96_v40 = vadd.f32 %v95_v39, %v33_v32 }
  0x95   :  { %v99_v41 = vmax.f32 %v96_v40, 0.0 }
  0x97   :  { %119 = vmatmul.f32.gmra.mxu1 %v99_v41 }
 0x10c   :  { %v117_v46 = vpop.f32.mrf.mxu1 }
 0x10d   :  { %v118_v47 = vadd.f32 %v117_v46, %v50_v45 }
 0x10f   :  { %v123_v48 = vmax.f32 %v118_v47, 0.0 }
 0x111   :  { %142 = vmatmul.f32.vlgmr.msra.gmra.mxu2 %v123_v48 }
 0x114   :  { %v120_v49 = vpop.f32.mrf.mxu1 }
 0x115   :  { %v121_v50 = vadd.f32 %v120_v49, %v50_v45 }
 0x117   :  { %v124_v51 = vmax.f32 %v121_v50, 0.0 }
 0x119   :  { %145 = vmatmul.f32.gmra.mxu2 %v124_v51 }
 0x194   :  { %v143_v53 = vpop.f32.mrf.mxu2 }
 0x195   :  { %v144_v54 = vadd.f32 %v336_v52, %v143_v53 }
 0x197   :  { %155 = vrot.lane.b32.xlu0 %v144_v54, %s374_s0  ;;  %v149_v57 = vmul.f32 0.25, %v144_v54 }
 0x199   :  { %v151_v58 = vperm.slane %v149_v57, 0 }
 0x19c   :  { %v146_v55 = vpop.f32.mrf.mxu2 }
 0x19d   :  { %v147_v56 = vadd.f32 %v336_v52, %v146_v55 }
 0x19f   :  { %157 = vrot.lane.b32.xlu0 %v147_v56, %s374_s0  ;;  %v150_v62 = vmul.f32 0.25, %v147_v56 }
 0x1a1   :  { %v152_v63 = vperm.slane %v150_v62, 0 }
 0x209   :  { %v156_v59 = vpop.permute.xlu0 %155 }
 0x20a   :  { %v161_v60 = vmul.f32 %v156_v59, %v151_v58 }
 0x20c   :  { %v164_v61 = vsel %vm163_vm1, %v161_v60, 0.0 }
 0x20d   :  { %165 = vadd.xlane.f32.xlu1 %v164_v61 }
 0x211   :  { %v158_v0 = vpop.permute.xlu0 %157 }
 0x212   :  { %v162_v1 = vmul.f32 %v158_v0, %v152_v63 }
 0x214   :  { %v167_v2 = vsel %vm163_vm1, %v162_v1, 0.0 }
 0x215   :  { %168 = vadd.xlane.f32.xlu1 %v167_v2 }
 0x280   :  { %v166_v3 = vpop.xlane.xlu1 %165 }
 0x281   :  { %v174_v7 = vperm.slane %v166_v3, %v404_v5 }
 0x288   :  { %v169_v6 = vpop.xlane.xlu1 %168 }
 0x289   :  { %v175_v8 = vperm.slane %v169_v6, %v404_v5 }
 0x28b   :  { %v177_v9 = vsel %vm176_vm2, %v175_v8, %v174_v7 }
 0x28c   :  { %v180_v10 = vsel %vm179_vm3, %v177_v9, -inf }
 0x28d   :  { %181 = vmax.xlane.f32.xlu2 %v180_v10 }
 0x300   :  { %v182_v12 = vpop.xlane.xlu2 %181 }
 0x301   :  { %v184_v13 = vperm.slane %v182_v12, 0  ;;  %v185_v14 = vperm.slane %v182_v12, 1 }
 0x303   :  { %v188_v15 = vsub.f32 %v166_v3, %v184_v13  ;;  %v189_v16 = vsub.f32 %v169_v6, %v185_v14 }
 0x305   :  { %v190_v17 = vmul.f32 1.442695, %v188_v15  ;;  %v192_v18 = vmul.f32 1.442695, %v189_v16 }
 0x307   :  { %337 = vpow2.f32 %v190_v17 }
 0x308   :  { %339 = vpow2.f32 %v192_v18 }
 0x30d   :  { %v338_v19 = vpop.eup %337 }
 0x30e   :  { %v340_v20 = vpop.eup %339  ;;  %197 = vperm.xlu2 %333, %v338_v19  }
 0x30f   :  { %200 = vperm.xlu0 %334, %v340_v20  }
 0x317   :  { %249 = vrot.lane.b32.xlu0 %v144_v54, %s376_s19  ;;  %v377_v54 = vmov 0.0  }
 0x318   :  { %310 = vst.msk [vmem:[%s448_s2 + $0x9] sm:$0x1] %vm307_vm12, %v377_v54 }
 0x319   :  { %311 = vst.msk [vmem:[%s448_s2 + $0x19] sm:$0x1] %vm307_vm12, %v377_v54 }
 0x31f   :  { %280 = vrot.lane.b32.xlu0 %v147_v56, %s376_s19 }
 0x368   :  { %v198_v21 = vpop.permute.xlu2 %197 }
 0x369   :  { %v202_v23 = vperm.slane %v198_v21, %v404_v5 }
 0x381   :  { %v201_v22 = vpop.permute.xlu0 %200 }
 0x382   :  { %v203_v24 = vperm.slane %v201_v22, %v404_v5 }
 0x384   :  { %v204_v25 = vsel %vm176_vm2, %v203_v24, %v202_v23 }
 0x385   :  { %v206_v26 = vsel %vm179_vm3, %v204_v25, 0.0 }
 0x386   :  { %207 = vadd.xlane.f32.xlu1 %v206_v26 }
 0x389   :  { %v250_v27 = vpop.permute.xlu0 %249 }
 0x38a   :  { %305 = vst.msk [vmem:[%s448_s2] sm:$0xff] %vm68_vm0, %v250_v27  ;;  %270 = vmatpush.msra.mxu3 %v250_v27 }
 0x391   :  { %v281_v28 = vpop.permute.xlu0 %280 }
 0x392   :  { %306 = vst.msk [vmem:[%s448_s2 + $0x10] sm:$0xff] %vm68_vm0, %v281_v28  ;;  %300 = vmatpush.msrb.mxu3 %v281_v28 }
 0x3f9   :  { %v208_v29 = vpop.xlane.xlu1 %207 }
 0x3fa   :  { %v210_v30 = vperm.slane %v208_v29, 0  ;;  %v211_v31 = vperm.slane %v208_v29, 1 }
 0x3fc   :  { %341 = vrcp.f32 %v210_v30  ;;  %v225_v38 = vand.u32 2147483648, %v210_v30  ;;  %v240_v39 = vand.u32 2147483648, %v211_v31  ;;  %v223_v41 = vand.u32 2147483647, %v210_v30 }
 0x3fd   :  { %343 = vrcp.f32 %v211_v31  ;;  %v238_v43 = vand.u32 2147483647, %v211_v31  ;;  %vm219_vm6 = vweird.f32 %v210_v30  ;;  %vm234_vm7 = vweird.f32 %v211_v31 }
 0x3fe   :  { %v226_v46 = vor.u32 1.1754944e-38, %v225_v38  ;;  %v241_v47 = vor.u32 1.1754944e-38, %v240_v39  ;;  %vm224_vm10 = vcmp.eq.f32.partialorder %v223_v41, 8.507059e+37 }
 0x3ff   :  { %vm239_vm11 = vcmp.eq.f32.partialorder %v238_v43, 8.507059e+37 }
 0x402   :  { %v342_v32 = vpop.eup %341 }
 0x403   :  { %v344_v33 = vpop.eup %343  ;;  %v215_v34 = vmul.f32 %v342_v32, %v210_v30  ;;  %vm220_vm4 = vweird.f32 %v342_v32 }
 0x404   :  { %v230_v35 = vmul.f32 %v344_v33, %v211_v31  ;;  %vm235_vm5 = vweird.f32 %v344_v33  ;;  %vm221_vm8 = vmor %vm219_vm6, %vm220_vm4 }
 0x405   :  { %v216_v36 = vsub.f32 1.0, %v215_v34  ;;  %vm236_vm9 = vmor %vm234_vm7, %vm235_vm5 }
 0x406   :  { %v231_v37 = vsub.f32 1.0, %v230_v35 }
 0x407   :  { %v217_v40 = vmul.f32 %v342_v32, %v216_v36 }
 0x408   :  { %v232_v42 = vmul.f32 %v344_v33, %v231_v37 }
 0x409   :  { %v218_v44 = vadd.f32 %v342_v32, %v217_v40 }
 0x40a   :  { %v233_v45 = vadd.f32 %v344_v33, %v232_v42 }
 0x40b   :  { %v222_v48 = vsel %vm221_vm8, %v342_v32, %v218_v44 }
 0x40c   :  { %v237_v49 = vsel %vm236_vm9, %v344_v33, %v233_v45  ;;  %v227_v50 = vsel %vm224_vm10, %v226_v46, %v222_v48 }
 0x40d   :  { %v242_v51 = vsel %vm239_vm11, %v241_v47, %v237_v49  ;;  %v228_v52 = vmul.f32 %v338_v19, %v227_v50 }
 0x40e   :  { %v243_v53 = vmul.f32 %v340_v20, %v242_v51 }
 0x40f   :  { %246 = vperm.xlu1 %335, %v228_v52  }
 0x410   :  { %277 = vperm.xlu2 %333, %v243_v53  }
 0x46a   :  { %v278_v55 = vpop.permute.xlu2 %277 }
 0x46b   :  { %v279_v56 = vperm.slane %v278_v55, %v404_v5 }
 0x46d   :  { %316 = vst.msk [vmem:[%s448_s2 + $0x19] sm:$0x1] %vm314_vm13, %v279_v56 }
 0x481   :  { %v247_v57 = vpop.permute.xlu1 %246 }
 0x482   :  { %v248_v58 = vperm.slane %v247_v57, %v404_v5 }
 0x484   :  { %324 = vmatmul.msk.f32.vlgmr.msra.gmra.mxu3 %vm252_vm14, %v248_v58  ;;  %315 = vst.msk [vmem:[%s448_s2 + $0x9] sm:$0x1] %vm314_vm13, %v248_v58 }
 0x48c   :  { %325 = vmatmul.msk.f32.vlgmr.msrb.gmra.mxu3 %vm252_vm14, %v279_v56 }
 0x507   :  { %v272_v59 = vpop.f32.mrf.mxu3 }
 0x508   :  { %308 = vst.msk [vmem:[%s448_s2 + $0x8] sm:$0x1] %vm307_vm12, %v272_v59 }
 0x50f   :  { %v302_v60 = vpop.f32.mrf.mxu3 }
 0x510   :  { %309 = vst.msk [vmem:[%s448_s2 + $0x18] sm:$0x1] %vm307_vm12, %v302_v60 }
 0x511   :  { %321 = vsyncpa [#allocation3], 1 }

</bundles_post_ra>
